<compile_context>
chip_gen: v7x
topology: tpu7x:2x2x1
jax: 0.10.0
libtpu: 0.0.40
codegen_flags: <defaults>
</compile_context>

<pallas_src>
import functools

import jax
import jax.numpy as jnp
from jax.experimental import pallas as pl
from jax.experimental.pallas import tpu as pltpu


def _round_up(x, m):
    return ((x + m - 1) // m) * m


def _pointnet_kernel(p_ref,
                     wpos_ref, bpos_ref,
                     w0_ref, b0_ref,
                     w1a_ref, w1b_ref, b1_ref,
                     w2a_ref, w2b_ref, b2_ref,
                     w3a_ref, w3b_ref, b3_ref,
                     wc_ref, bc_ref,
                     out_ref):
    BB, T, D = p_ref.shape          # BB point clouds, T (padded) points, D (padded) dims
    H = w0_ref.shape[1]
    N = BB * T
    f32 = jnp.float32
    bf16 = jnp.bfloat16

    # ---- fc_pos on the flattened slab: (BB*T, D) @ (D, 2H) -----------------
    x = p_ref[...].reshape(N, D).astype(bf16)
    net = jnp.dot(x, wpos_ref[...], preferred_element_type=f32) + bpos_ref[...]   # (N, 2H) f32

    # ---- fc_0: (BB*T, 2H) @ (2H, H) -----------------------------------------
    net = jnp.dot(jnp.maximum(net, 0.0).astype(bf16), w0_ref[...],
                  preferred_element_type=f32) + b0_ref[...]                       # (N, H) f32

    def pool_cat_fc(net, wa_ref, wb_ref, b_ref):
        # fc(relu(cat([net, maxpool(net).expand_as(net)], -1)))
        #   == relu(net) @ W[:H]  +  relu(pooled) @ W[H:]  +  b
        # Per-cloud max-pool on a (BB, T, H) view; pooled branch batched across
        # clouds as ONE (BB, H) @ (H, H) MXU push per layer.
        pooled = jnp.max(net.reshape(BB, T, H), axis=1)                           # (BB, H) f32
        per_point = jnp.dot(jnp.maximum(net, 0.0).astype(bf16), wa_ref[...],
                            preferred_element_type=f32)                           # (N, H)
        per_cloud = jnp.dot(jnp.maximum(pooled, 0.0).astype(bf16), wb_ref[...],
                            preferred_element_type=f32)                           # (BB, H)
        per_cloud = jnp.broadcast_to(per_cloud[:, None, :], (BB, T, H)).reshape(N, H)
        return per_point + per_cloud + b_ref[...]

    net = pool_cat_fc(net, w1a_ref, w1b_ref, b1_ref)
    net = pool_cat_fc(net, w2a_ref, w2b_ref, b2_ref)
    net = pool_cat_fc(net, w3a_ref, w3b_ref, b3_ref)

    # ---- final global max-pool over points, then fc_c(relu(.)) --------------
    pooled = jnp.max(net.reshape(BB, T, H), axis=1)                               # (BB, H)
    c = jnp.dot(jnp.maximum(pooled, 0.0).astype(bf16), wc_ref[...],
                preferred_element_type=f32) + bc_ref[...]                         # (BB, c_dim)
    out_ref[...] = c.astype(out_ref.dtype)


def _choose_bb(B, T_pad, D_pad, H, c_dim,
               target_rows=1024, vmem_budget_bytes=20 << 20):
    """How many point clouds to process per grid step (targets >=~1K MXU rows
    per step while keeping resident activations within a conservative VMEM
    budget that also fits v7x's smaller 64 MiB VMEM)."""
    # Resident weights (bf16), counted double-buffered.
    weight_bytes = 2 * 2 * (D_pad * 2 * H + 4 * 2 * H * H + H * c_dim)
    # Activation bytes per point row: f32 slabs + transient bf16 dot copies.
    bytes_per_row = 8 * D_pad + 6 * (2 * H) + 12 * H
    avail = max(vmem_budget_bytes - weight_bytes, bytes_per_row * T_pad)
    rows = int(min(target_rows, max(T_pad, avail // bytes_per_row)))
    bb = max(1, rows // T_pad)
    if bb >= B:
        return B                       # single grid step: block == full batch
    return max(8, (bb // 8) * 8)       # multi-step: BB multiple of 8 (out block sublane rule)


def simple_pointnet_forward(p, params):
    """p: (B, T, D) float32 point clouds.  Returns (B, c_dim) float32."""
    B, T, D = p.shape
    (wpos, bpos, w0, b0, w1, b1, w2, b2, w3, b3, wc, bc) = params
    H = w0.shape[1]
    c_dim = wc.shape[1]
    f32, bf16 = jnp.float32, jnp.bfloat16

    # -- pad point dim D to a multiple of 8 (zero features + zero weight rows)
    D_pad = _round_up(D, 8)
    if D_pad != D:
        p = jnp.pad(p, ((0, 0), (0, 0), (0, D_pad - D)))
        wpos = jnp.pad(wpos, ((0, D_pad - D), (0, 0)))

    # -- pad T to a multiple of 8 with duplicated points (max-pool invariant)
    T_pad = _round_up(T, 8)
    if T_pad != T:
        dup = jnp.broadcast_to(p[:, :1, :], (B, T_pad - T, D_pad))
        p = jnp.concatenate([p, dup], axis=1)

    # -- choose per-step cloud block BB; pad B with duplicate clouds (sliced off)
    BB = _choose_bb(B, T_pad, D_pad, H, c_dim)
    B_pad = _round_up(B, BB)
    if B_pad != B:
        dup = jnp.broadcast_to(p[:1], (B_pad - B, T_pad, D_pad))
        p = jnp.concatenate([p, dup], axis=0)
    num_blocks = B_pad // BB
    # TODO(synk): on v7x, prefer num_blocks >= 2 so both TensorCores get work.

    # -- weights to bf16 for the MXU; biases stay f32.  Split the pool-cat
    #    weights into per-point / pooled halves so the pooled branch is one
    #    batched (BB, H) @ (H, H) matmul per layer.
    w1a, w1b = w1[:H], w1[H:]
    w2a, w2b = w2[:H], w2[H:]
    w3a, w3b = w3[:H], w3[H:]
    wpos_b, w0_b = wpos.astype(bf16), w0.astype(bf16)
    w1a_b, w1b_b = w1a.astype(bf16), w1b.astype(bf16)
    w2a_b, w2b_b = w2a.astype(bf16), w2b.astype(bf16)
    w3a_b, w3b_b = w3a.astype(bf16), w3b.astype(bf16)
    wc_b = wc.astype(bf16)
    bpos_f, b0_f, b1_f, b2_f, b3_f, bc_f = (
        bpos.astype(f32), b0.astype(f32), b1.astype(f32),
        b2.astype(f32), b3.astype(f32), bc.astype(f32))

    def full(a):
        return pl.BlockSpec(a.shape, lambda i, _n=a.ndim: (0,) * _n)

    out = pl.pallas_call(
        _pointnet_kernel,
        out_shape=jax.ShapeDtypeStruct((B_pad, c_dim), f32),
        grid_spec=pltpu.PrefetchScalarGridSpec(
            num_scalar_prefetch=0,
            grid=(num_blocks,),
            in_specs=[
                pl.BlockSpec((BB, T_pad, D_pad), lambda i: (i, 0, 0)),
                full(wpos_b), full(bpos_f),
                full(w0_b), full(b0_f),
                full(w1a_b), full(w1b_b), full(b1_f),
                full(w2a_b), full(w2b_b), full(b2_f),
                full(w3a_b), full(w3b_b), full(b3_f),
                full(wc_b), full(bc_f),
            ],
            out_specs=pl.BlockSpec((BB, c_dim), lambda i: (i, 0)),
        ),
        compiler_params=pltpu.CompilerParams(
            dimension_semantics=("parallel",),
            vmem_limit_bytes=48 * 1024 * 1024,
        ),
    )(p, wpos_b, bpos_f, w0_b, b0_f,
      w1a_b, w1b_b, b1_f, w2a_b, w2b_b, b2_f, w3a_b, w3b_b, b3_f,
      wc_b, bc_f)
    return out[:B]


def init_params(key, dim=3, hidden_dim=32, c_dim=16):
    """Deterministic init mirroring nn.Linear's U(-1/sqrt(fan_in), +1/sqrt(fan_in)),
    with weights stored transposed as (in, out)."""
    def linear(k, fan_in, fan_out):
        k1, k2 = jax.random.split(k)
        bound = 1.0 / jnp.sqrt(fan_in)
        w = jax.random.uniform(k1, (fan_in, fan_out), jnp.float32, -bound, bound)
        b = jax.random.uniform(k2, (1, fan_out), jnp.float32, -bound, bound)
        return w, b

    keys = jax.random.split(key, 6)
    wpos, bpos = linear(keys[0], dim, 2 * hidden_dim)
    w0, b0 = linear(keys[1], 2 * hidden_dim, hidden_dim)
    w1, b1 = linear(keys[2], 2 * hidden_dim, hidden_dim)
    w2, b2 = linear(keys[3], 2 * hidden_dim, hidden_dim)
    w3, b3 = linear(keys[4], 2 * hidden_dim, hidden_dim)
    wc, bc = linear(keys[5], hidden_dim, c_dim)
    return (wpos, bpos, w0, b0, w1, b1, w2, b2, w3, b3, wc, bc)


def reference_forward(p, params):
    """Pure-JAX f32 reference matching the PyTorch forward semantics."""
    (wpos, bpos, w0, b0, w1, b1, w2, b2, w3, b3, wc, bc) = params
    relu = lambda x: jnp.maximum(x, 0.0)
    net = p @ wpos + bpos
    net = relu(net) @ w0 + b0
    for w, b in ((w1, b1), (w2, b2), (w3, b3)):
        pooled = jnp.max(net, axis=1, keepdims=True)
        cat = jnp.concatenate([net, jnp.broadcast_to(pooled, net.shape)], axis=-1)
        net = relu(cat) @ w + b
    net = jnp.max(net, axis=1)
    return relu(net) @ wc + bc


if __name__ == "__main__":
    B, T, D = 2, 8, 3
    hidden_dim, c_dim = 32, 16

    key = jax.random.PRNGKey(0)
    kp, kw = jax.random.split(key)
    p = jax.random.normal(kp, (B, T, D), jnp.float32)
    params = init_params(kw, dim=D, hidden_dim=hidden_dim, c_dim=c_dim)

    fwd = jax.jit(simple_pointnet_forward)
    out = jax.block_until_ready(fwd(p, params))

    ref = reference_forward(p, params)
    assert out.shape == (B, c_dim)
    # bf16 MXU inputs (f32 accumulation) vs pure-f32 reference -> small drift.
    assert jnp.allclose(out, ref, atol=5e-2, rtol=5e-2), "mismatch vs reference"
    print("KERNEL_OK")
</pallas_src>

<mosaic_0001>
module attributes {stable_mosaic.version = 11 : i64} {
  func.func @_pointnet_kernel(%arg0: i32, %arg1: memref<2x8x8xf32, #tpu.memory_space<vmem>>, %arg2: memref<8x64xbf16, #tpu.memory_space<vmem>>, %arg3: memref<1x64xf32, #tpu.memory_space<vmem>>, %arg4: memref<64x32xbf16, #tpu.memory_space<vmem>>, %arg5: memref<1x32xf32, #tpu.memory_space<vmem>>, %arg6: memref<32x32xbf16, #tpu.memory_space<vmem>>, %arg7: memref<32x32xbf16, #tpu.memory_space<vmem>>, %arg8: memref<1x32xf32, #tpu.memory_space<vmem>>, %arg9: memref<32x32xbf16, #tpu.memory_space<vmem>>, %arg10: memref<32x32xbf16, #tpu.memory_space<vmem>>, %arg11: memref<1x32xf32, #tpu.memory_space<vmem>>, %arg12: memref<32x32xbf16, #tpu.memory_space<vmem>>, %arg13: memref<32x32xbf16, #tpu.memory_space<vmem>>, %arg14: memref<1x32xf32, #tpu.memory_space<vmem>>, %arg15: memref<32x16xbf16, #tpu.memory_space<vmem>>, %arg16: memref<1x16xf32, #tpu.memory_space<vmem>>, %arg17: memref<2x16xf32, #tpu.memory_space<vmem>>) attributes {dimension_semantics = [#tpu.dimension_semantics<parallel>], iteration_bounds = array<i64: 1>, scalar_prefetch = 0 : i64, scratch_operands = 0 : i64, tpu.core_type = #tpu.core_type<tc>, window_params = [{transform_indices = @transform_0, window_bounds = array<i64: 2, 8, 8>}, {pipeline_mode = #tpu.pipeline_mode<synchronous>, transform_indices = @transform_1, window_bounds = array<i64: 8, 64>}, {pipeline_mode = #tpu.pipeline_mode<synchronous>, transform_indices = @transform_2, window_bounds = array<i64: 1, 64>}, {pipeline_mode = #tpu.pipeline_mode<synchronous>, transform_indices = @transform_3, window_bounds = array<i64: 64, 32>}, {pipeline_mode = #tpu.pipeline_mode<synchronous>, transform_indices = @transform_4, window_bounds = array<i64: 1, 32>}, {pipeline_mode = #tpu.pipeline_mode<synchronous>, transform_indices = @transform_5, window_bounds = array<i64: 32, 32>}, {pipeline_mode = #tpu.pipeline_mode<synchronous>, transform_indices = @transform_6, window_bounds = array<i64: 32, 32>}, {pipeline_mode = #tpu.pipeline_mode<synchronous>, transform_indices = @transform_7, window_bounds = array<i64: 1, 32>}, {pipeline_mode = #tpu.pipeline_mode<synchronous>, transform_indices = @transform_8, window_bounds = array<i64: 32, 32>}, {pipeline_mode = #tpu.pipeline_mode<synchronous>, transform_indices = @transform_9, window_bounds = array<i64: 32, 32>}, {pipeline_mode = #tpu.pipeline_mode<synchronous>, transform_indices = @transform_10, window_bounds = array<i64: 1, 32>}, {pipeline_mode = #tpu.pipeline_mode<synchronous>, transform_indices = @transform_11, window_bounds = array<i64: 32, 32>}, {pipeline_mode = #tpu.pipeline_mode<synchronous>, transform_indices = @transform_12, window_bounds = array<i64: 32, 32>}, {pipeline_mode = #tpu.pipeline_mode<synchronous>, transform_indices = @transform_13, window_bounds = array<i64: 1, 32>}, {pipeline_mode = #tpu.pipeline_mode<synchronous>, transform_indices = @transform_14, window_bounds = array<i64: 32, 16>}, {pipeline_mode = #tpu.pipeline_mode<synchronous>, transform_indices = @transform_15, window_bounds = array<i64: 1, 16>}, {transform_indices = @transform_16, window_bounds = array<i64: 2, 16>}]} {
    %c0 = arith.constant 0 : index
    %c0_0 = arith.constant 0 : index
    %c0_1 = arith.constant 0 : index
    %0 = vector.load %arg1[%c0, %c0_0, %c0_1] : memref<2x8x8xf32, #tpu.memory_space<vmem>>, vector<2x8x8xf32>
    %1 = vector.shape_cast %0 : vector<2x8x8xf32> to vector<16x8xf32>
    %2 = arith.truncf %1 : vector<16x8xf32> to vector<16x8xbf16>
    %c0_2 = arith.constant 0 : index
    %c0_3 = arith.constant 0 : index
    %3 = vector.load %arg2[%c0_2, %c0_3] : memref<8x64xbf16, #tpu.memory_space<vmem>>, vector<8x64xbf16>
    %cst = arith.constant dense<0.000000e+00> : vector<16x64xf32>
    %4 = tpu.matmul %2, %3, %cst {dimension_numbers = #tpu.dot_dimension_numbers<[1], [0], [0], [1], [0, 0, 1, 1], [], []>} : vector<16x8xbf16>, vector<8x64xbf16>, vector<16x64xf32> -> vector<16x64xf32>
    %c0_4 = arith.constant 0 : index
    %c0_5 = arith.constant 0 : index
    %5 = vector.load %arg3[%c0_4, %c0_5] : memref<1x64xf32, #tpu.memory_space<vmem>>, vector<1x64xf32>
    %6 = vector.broadcast %5 : vector<1x64xf32> to vector<16x64xf32>
    %7 = arith.addf %4, %6 : vector<16x64xf32>
    %cst_6 = arith.constant 0.000000e+00 : f32
    %8 = vector.broadcast %cst_6 : f32 to vector<16x64xf32>
    %9 = arith.maximumf %7, %8 : vector<16x64xf32>
    %10 = arith.truncf %9 : vector<16x64xf32> to vector<16x64xbf16>
    %c0_7 = arith.constant 0 : index
    %c0_8 = arith.constant 0 : index
    %11 = vector.load %arg4[%c0_7, %c0_8] : memref<64x32xbf16, #tpu.memory_space<vmem>>, vector<64x32xbf16>
    %cst_9 = arith.constant dense<0.000000e+00> : vector<16x32xf32>
    %12 = tpu.matmul %10, %11, %cst_9 {dimension_numbers = #tpu.dot_dimension_numbers<[1], [0], [0], [1], [0, 0, 1, 1], [], []>} : vector<16x64xbf16>, vector<64x32xbf16>, vector<16x32xf32> -> vector<16x32xf32>
    %c0_10 = arith.constant 0 : index
    %c0_11 = arith.constant 0 : index
    %13 = vector.load %arg5[%c0_10, %c0_11] : memref<1x32xf32, #tpu.memory_space<vmem>>, vector<1x32xf32>
    %14 = vector.broadcast %13 : vector<1x32xf32> to vector<16x32xf32>
    %15 = arith.addf %12, %14 : vector<16x32xf32>
    %16 = vector.shape_cast %15 : vector<16x32xf32> to vector<2x8x32xf32>
    %cst_12 = arith.constant dense<0xFF800000> : vector<2x32xf32>
    %17 = vector.multi_reduction <maximumf>, %16, %cst_12 [1] : vector<2x8x32xf32> to vector<2x32xf32>
    %cst_13 = arith.constant 0.000000e+00 : f32
    %18 = vector.broadcast %cst_13 : f32 to vector<16x32xf32>
    %19 = arith.maximumf %15, %18 : vector<16x32xf32>
    %20 = arith.truncf %19 : vector<16x32xf32> to vector<16x32xbf16>
    %c0_14 = arith.constant 0 : index
    %c0_15 = arith.constant 0 : index
    %21 = vector.load %arg6[%c0_14, %c0_15] : memref<32x32xbf16, #tpu.memory_space<vmem>>, vector<32x32xbf16>
    %cst_16 = arith.constant dense<0.000000e+00> : vector<16x32xf32>
    %22 = tpu.matmul %20, %21, %cst_16 {dimension_numbers = #tpu.dot_dimension_numbers<[1], [0], [0], [1], [0, 0, 1, 1], [], []>} : vector<16x32xbf16>, vector<32x32xbf16>, vector<16x32xf32> -> vector<16x32xf32>
    %cst_17 = arith.constant 0.000000e+00 : f32
    %23 = vector.broadcast %cst_17 : f32 to vector<2x32xf32>
    %24 = arith.maximumf %17, %23 : vector<2x32xf32>
    %25 = arith.truncf %24 : vector<2x32xf32> to vector<2x32xbf16>
    %c0_18 = arith.constant 0 : index
    %c0_19 = arith.constant 0 : index
    %26 = vector.load %arg7[%c0_18, %c0_19] : memref<32x32xbf16, #tpu.memory_space<vmem>>, vector<32x32xbf16>
    %cst_20 = arith.constant dense<0.000000e+00> : vector<2x32xf32>
    %27 = tpu.matmul %25, %26, %cst_20 {dimension_numbers = #tpu.dot_dimension_numbers<[1], [0], [0], [1], [0, 0, 1, 1], [], []>} : vector<2x32xbf16>, vector<32x32xbf16>, vector<2x32xf32> -> vector<2x32xf32>
    %28 = vector.shape_cast %27 : vector<2x32xf32> to vector<2x1x32xf32>
    %29 = vector.shape_cast %28 : vector<2x1x32xf32> to vector<2x1x32xf32>
    %30 = vector.broadcast %29 : vector<2x1x32xf32> to vector<2x8x32xf32>
    %31 = vector.shape_cast %30 : vector<2x8x32xf32> to vector<16x32xf32>
    %32 = arith.addf %22, %31 : vector<16x32xf32>
    %c0_21 = arith.constant 0 : index
    %c0_22 = arith.constant 0 : index
    %33 = vector.load %arg8[%c0_21, %c0_22] : memref<1x32xf32, #tpu.memory_space<vmem>>, vector<1x32xf32>
    %34 = vector.broadcast %33 : vector<1x32xf32> to vector<16x32xf32>
    %35 = arith.addf %32, %34 : vector<16x32xf32>
    %36 = vector.shape_cast %35 : vector<16x32xf32> to vector<2x8x32xf32>
    %cst_23 = arith.constant dense<0xFF800000> : vector<2x32xf32>
    %37 = vector.multi_reduction <maximumf>, %36, %cst_23 [1] : vector<2x8x32xf32> to vector<2x32xf32>
    %cst_24 = arith.constant 0.000000e+00 : f32
    %38 = vector.broadcast %cst_24 : f32 to vector<16x32xf32>
    %39 = arith.maximumf %35, %38 : vector<16x32xf32>
    %40 = arith.truncf %39 : vector<16x32xf32> to vector<16x32xbf16>
    %c0_25 = arith.constant 0 : index
    %c0_26 = arith.constant 0 : index
    %41 = vector.load %arg9[%c0_25, %c0_26] : memref<32x32xbf16, #tpu.memory_space<vmem>>, vector<32x32xbf16>
    %cst_27 = arith.constant dense<0.000000e+00> : vector<16x32xf32>
    %42 = tpu.matmul %40, %41, %cst_27 {dimension_numbers = #tpu.dot_dimension_numbers<[1], [0], [0], [1], [0, 0, 1, 1], [], []>} : vector<16x32xbf16>, vector<32x32xbf16>, vector<16x32xf32> -> vector<16x32xf32>
    %cst_28 = arith.constant 0.000000e+00 : f32
    %43 = vector.broadcast %cst_28 : f32 to vector<2x32xf32>
    %44 = arith.maximumf %37, %43 : vector<2x32xf32>
    %45 = arith.truncf %44 : vector<2x32xf32> to vector<2x32xbf16>
    %c0_29 = arith.constant 0 : index
    %c0_30 = arith.constant 0 : index
    %46 = vector.load %arg10[%c0_29, %c0_30] : memref<32x32xbf16, #tpu.memory_space<vmem>>, vector<32x32xbf16>
    %cst_31 = arith.constant dense<0.000000e+00> : vector<2x32xf32>
    %47 = tpu.matmul %45, %46, %cst_31 {dimension_numbers = #tpu.dot_dimension_numbers<[1], [0], [0], [1], [0, 0, 1, 1], [], []>} : vector<2x32xbf16>, vector<32x32xbf16>, vector<2x32xf32> -> vector<2x32xf32>
    %48 = vector.shape_cast %47 : vector<2x32xf32> to vector<2x1x32xf32>
    %49 = vector.shape_cast %48 : vector<2x1x32xf32> to vector<2x1x32xf32>
    %50 = vector.broadcast %49 : vector<2x1x32xf32> to vector<2x8x32xf32>
    %51 = vector.shape_cast %50 : vector<2x8x32xf32> to vector<16x32xf32>
    %52 = arith.addf %42, %51 : vector<16x32xf32>
    %c0_32 = arith.constant 0 : index
    %c0_33 = arith.constant 0 : index
    %53 = vector.load %arg11[%c0_32, %c0_33] : memref<1x32xf32, #tpu.memory_space<vmem>>, vector<1x32xf32>
    %54 = vector.broadcast %53 : vector<1x32xf32> to vector<16x32xf32>
    %55 = arith.addf %52, %54 : vector<16x32xf32>
    %56 = vector.shape_cast %55 : vector<16x32xf32> to vector<2x8x32xf32>
    %cst_34 = arith.constant dense<0xFF800000> : vector<2x32xf32>
    %57 = vector.multi_reduction <maximumf>, %56, %cst_34 [1] : vector<2x8x32xf32> to vector<2x32xf32>
    %cst_35 = arith.constant 0.000000e+00 : f32
    %58 = vector.broadcast %cst_35 : f32 to vector<16x32xf32>
    %59 = arith.maximumf %55, %58 : vector<16x32xf32>
    %60 = arith.truncf %59 : vector<16x32xf32> to vector<16x32xbf16>
    %c0_36 = arith.constant 0 : index
    %c0_37 = arith.constant 0 : index
    %61 = vector.load %arg12[%c0_36, %c0_37] : memref<32x32xbf16, #tpu.memory_space<vmem>>, vector<32x32xbf16>
    %cst_38 = arith.constant dense<0.000000e+00> : vector<16x32xf32>
    %62 = tpu.matmul %60, %61, %cst_38 {dimension_numbers = #tpu.dot_dimension_numbers<[1], [0], [0], [1], [0, 0, 1, 1], [], []>} : vector<16x32xbf16>, vector<32x32xbf16>, vector<16x32xf32> -> vector<16x32xf32>
    %cst_39 = arith.constant 0.000000e+00 : f32
    %63 = vector.broadcast %cst_39 : f32 to vector<2x32xf32>
    %64 = arith.maximumf %57, %63 : vector<2x32xf32>
    %65 = arith.truncf %64 : vector<2x32xf32> to vector<2x32xbf16>
    %c0_40 = arith.constant 0 : index
    %c0_41 = arith.constant 0 : index
    %66 = vector.load %arg13[%c0_40, %c0_41] : memref<32x32xbf16, #tpu.memory_space<vmem>>, vector<32x32xbf16>
    %cst_42 = arith.constant dense<0.000000e+00> : vector<2x32xf32>
    %67 = tpu.matmul %65, %66, %cst_42 {dimension_numbers = #tpu.dot_dimension_numbers<[1], [0], [0], [1], [0, 0, 1, 1], [], []>} : vector<2x32xbf16>, vector<32x32xbf16>, vector<2x32xf32> -> vector<2x32xf32>
    %68 = vector.shape_cast %67 : vector<2x32xf32> to vector<2x1x32xf32>
    %69 = vector.shape_cast %68 : vector<2x1x32xf32> to vector<2x1x32xf32>
    %70 = vector.broadcast %69 : vector<2x1x32xf32> to vector<2x8x32xf32>
    %71 = vector.shape_cast %70 : vector<2x8x32xf32> to vector<16x32xf32>
    %72 = arith.addf %62, %71 : vector<16x32xf32>
    %c0_43 = arith.constant 0 : index
    %c0_44 = arith.constant 0 : index
    %73 = vector.load %arg14[%c0_43, %c0_44] : memref<1x32xf32, #tpu.memory_space<vmem>>, vector<1x32xf32>
    %74 = vector.broadcast %73 : vector<1x32xf32> to vector<16x32xf32>
    %75 = arith.addf %72, %74 : vector<16x32xf32>
    %76 = vector.shape_cast %75 : vector<16x32xf32> to vector<2x8x32xf32>
    %cst_45 = arith.constant dense<0xFF800000> : vector<2x32xf32>
    %77 = vector.multi_reduction <maximumf>, %76, %cst_45 [1] : vector<2x8x32xf32> to vector<2x32xf32>
    %cst_46 = arith.constant 0.000000e+00 : f32
    %78 = vector.broadcast %cst_46 : f32 to vector<2x32xf32>
    %79 = arith.maximumf %77, %78 : vector<2x32xf32>
    %80 = arith.truncf %79 : vector<2x32xf32> to vector<2x32xbf16>
    %c0_47 = arith.constant 0 : index
    %c0_48 = arith.constant 0 : index
    %81 = vector.load %arg15[%c0_47, %c0_48] : memref<32x16xbf16, #tpu.memory_space<vmem>>, vector<32x16xbf16>
    %cst_49 = arith.constant dense<0.000000e+00> : vector<2x16xf32>
    %82 = tpu.matmul %80, %81, %cst_49 {dimension_numbers = #tpu.dot_dimension_numbers<[1], [0], [0], [1], [0, 0, 1, 1], [], []>} : vector<2x32xbf16>, vector<32x16xbf16>, vector<2x16xf32> -> vector<2x16xf32>
    %c0_50 = arith.constant 0 : index
    %c0_51 = arith.constant 0 : index
    %83 = vector.load %arg16[%c0_50, %c0_51] : memref<1x16xf32, #tpu.memory_space<vmem>>, vector<1x16xf32>
    %84 = vector.broadcast %83 : vector<1x16xf32> to vector<2x16xf32>
    %85 = arith.addf %82, %84 : vector<2x16xf32>
    %c0_52 = arith.constant 0 : index
    %c0_53 = arith.constant 0 : index
    %86 = vector.load %arg17[%c0_52, %c0_53] : memref<2x16xf32, #tpu.memory_space<vmem>>, vector<2x16xf32>
    tpu.vector_store %arg17[%c0_52, %c0_53], %85 {strides = array<i32>} : memref<2x16xf32, #tpu.memory_space<vmem>>, vector<2x16xf32>,
    return
  }
  func.func @transform_0(%arg0: i32) -> (i32, i32, i32) {
    %c0_i32 = arith.constant 0 : i32
    %c0_i32_0 = arith.constant 0 : i32
    %c0_i32_1 = arith.constant 0 : i32
    return %arg0, %c0_i32, %c0_i32_0 : i32, i32, i32
  }
  func.func @transform_1(%arg0: i32) -> (i32, i32) {
    %c0_i32 = arith.constant 0 : i32
    %c0_i32_0 = arith.constant 0 : i32
    %c0_i32_1 = arith.constant 0 : i32
    return %c0_i32, %c0_i32_0 : i32, i32
  }
  func.func @transform_2(%arg0: i32) -> (i32, i32) {
    %c0_i32 = arith.constant 0 : i32
    %c0_i32_0 = arith.constant 0 : i32
    %c0_i32_1 = arith.constant 0 : i32
    return %c0_i32, %c0_i32_0 : i32, i32
  }
  func.func @transform_3(%arg0: i32) -> (i32, i32) {
    %c0_i32 = arith.constant 0 : i32
    %c0_i32_0 = arith.constant 0 : i32
    %c0_i32_1 = arith.constant 0 : i32
    return %c0_i32, %c0_i32_0 : i32, i32
  }
  func.func @transform_4(%arg0: i32) -> (i32, i32) {
    %c0_i32 = arith.constant 0 : i32
    %c0_i32_0 = arith.constant 0 : i32
    %c0_i32_1 = arith.constant 0 : i32
    return %c0_i32, %c0_i32_0 : i32, i32
  }
  func.func @transform_5(%arg0: i32) -> (i32, i32) {
    %c0_i32 = arith.constant 0 : i32
    %c0_i32_0 = arith.constant 0 : i32
    %c0_i32_1 = arith.constant 0 : i32
    return %c0_i32, %c0_i32_0 : i32, i32
  }
  func.func @transform_6(%arg0: i32) -> (i32, i32) {
    %c0_i32 = arith.constant 0 : i32
    %c0_i32_0 = arith.constant 0 : i32
    %c0_i32_1 = arith.constant 0 : i32
    return %c0_i32, %c0_i32_0 : i32, i32
  }
  func.func @transform_7(%arg0: i32) -> (i32, i32) {
    %c0_i32 = arith.constant 0 : i32
    %c0_i32_0 = arith.constant 0 : i32
    %c0_i32_1 = arith.constant 0 : i32
    return %c0_i32, %c0_i32_0 : i32, i32
  }
  func.func @transform_8(%arg0: i32) -> (i32, i32) {
    %c0_i32 = arith.constant 0 : i32
    %c0_i32_0 = arith.constant 0 : i32
    %c0_i32_1 = arith.constant 0 : i32
    return %c0_i32, %c0_i32_0 : i32, i32
  }
  func.func @transform_9(%arg0: i32) -> (i32, i32) {
    %c0_i32 = arith.constant 0 : i32
    %c0_i32_0 = arith.constant 0 : i32
    %c0_i32_1 = arith.constant 0 : i32
    return %c0_i32, %c0_i32_0 : i32, i32
  }
  func.func @transform_10(%arg0: i32) -> (i32, i32) {
    %c0_i32 = arith.constant 0 : i32
    %c0_i32_0 = arith.constant 0 : i32
    %c0_i32_1 = arith.constant 0 : i32
    return %c0_i32, %c0_i32_0 : i32, i32
  }
  func.func @transform_11(%arg0: i32) -> (i32, i32) {
    %c0_i32 = arith.constant 0 : i32
    %c0_i32_0 = arith.constant 0 : i32
    %c0_i32_1 = arith.constant 0 : i32
    return %c0_i32, %c0_i32_0 : i32, i32
  }
  func.func @transform_12(%arg0: i32) -> (i32, i32) {
    %c0_i32 = arith.constant 0 : i32
    %c0_i32_0 = arith.constant 0 : i32
    %c0_i32_1 = arith.constant 0 : i32
    return %c0_i32, %c0_i32_0 : i32, i32
  }
  func.func @transform_13(%arg0: i32) -> (i32, i32) {
    %c0_i32 = arith.constant 0 : i32
    %c0_i32_0 = arith.constant 0 : i32
    %c0_i32_1 = arith.constant 0 : i32
    return %c0_i32, %c0_i32_0 : i32, i32
  }
  func.func @transform_14(%arg0: i32) -> (i32, i32) {
    %c0_i32 = arith.constant 0 : i32
    %c0_i32_0 = arith.constant 0 : i32
    %c0_i32_1 = arith.constant 0 : i32
    return %c0_i32, %c0_i32_0 : i32, i32
  }
  func.func @transform_15(%arg0: i32) -> (i32, i32) {
    %c0_i32 = arith.constant 0 : i32
    %c0_i32_0 = arith.constant 0 : i32
    %c0_i32_1 = arith.constant 0 : i32
    return %c0_i32, %c0_i32_0 : i32, i32
  }
  func.func @transform_16(%arg0: i32) -> (i32, i32) {
    %c0_i32 = arith.constant 0 : i32
    %c0_i32_0 = arith.constant 0 : i32
    return %arg0, %c0_i32 : i32, i32
  }
}

</mosaic_0001>

<bundles_post_ra>
// kernel: simple_pointnet_forward.1
= control target key start
LH: loop header
LB: loop body
LE: loop exit
PB: predicated region body
PF: predicated region fallthrough
CT: control target
= control target key end

     0   :  { %s1312_s0 = inlined_call_operand.vmem [shape: f32[2,8,8], index: 0, kind: input, shape index: {}]   ;;  %s1313_s1 = inlined_call_operand.vmem [shape: bf16[8,64], index: 1, kind: input, shape index: {}]   ;;  %s1314_s2 = inlined_call_operand.vmem [shape: f32[1,64], index: 2, kind: input, shape index: {}]   ;;  %s1315_s3 = inlined_call_operand.vmem [shape: bf16[64,32], index: 3, kind: input, shape index: {}]   ;;  %s1316_s4 = inlined_call_operand.vmem [shape: f32[1,32], index: 4, kind: input, shape index: {}]   ;;  %s1317_s5 = inlined_call_operand.vmem [shape: bf16[32,32], index: 5, kind: input, shape index: {}]   ;;  %s1318_s6 = inlined_call_operand.vmem [shape: bf16[32,32], index: 6, kind: input, shape index: {}]   ;;  %s1319_s7 = inlined_call_operand.vmem [shape: f32[1,32], index: 7, kind: input, shape index: {}]   ;;  %s1320_s8 = inlined_call_operand.vmem [shape: bf16[32,32], index: 8, kind: input, shape index: {}]   ;;  %s1321_s9 = inlined_call_operand.vmem [shape: bf16[32,32], index: 9, kind: input, shape index: {}]   ;;  %s1322_s10 = inlined_call_operand.vmem [shape: f32[1,32], index: 10, kind: input, shape index: {}]   ;;  %s1323_s11 = inlined_call_operand.vmem [shape: bf16[32,32], index: 11, kind: input, shape index: {}]   ;;  %s1324_s12 = inlined_call_operand.vmem [shape: bf16[32,32], index: 12, kind: input, shape index: {}]   ;;  %s1325_s13 = inlined_call_operand.vmem [shape: f32[1,32], index: 13, kind: input, shape index: {}]   ;;  %s1326_s14 = inlined_call_operand.vmem [shape: bf16[32,16], index: 14, kind: input, shape index: {}]   ;;  %s1327_s15 = inlined_call_operand.vmem [shape: f32[1,16], index: 15, kind: input, shape index: {}]   ;;  %s1328_s16 = inlined_call_operand.hbm [shape: f32[2,16], index: 16, kind: output, shape index: {}]  }
   0x1   :  { %1330 = sst [smem:[#allocation5_spill]] %s1312_s0 }
   0x2   :  { %v58_v0 = vld [vmem:[%s1313_s1] sm:$0xf]  ;;  %vm70_vm0 = vcmask 1043456   ;;  %s1331_s25 = sld [smem:[#allocation5_spill]]  ;;  %v1055_v2 = vmov 0.0   ;;  %vm1056_vm1 = vmmov 0  }
   0x3   :  { %935 = vmatprep.subr.bf16.mxu0 %v1055_v2  ;;  %v72_v3 = vsel %vm70_vm0, %v58_v0, 0  ;;  %937 = vmatprep.mubr.msk.bf16.mxu0 %vm1056_vm1, %v1055_v2  ;;  %vm66_vm2 = vcmask 64512   ;;  %v1013_v5 = vld [vmem:[%s1315_s3] sm:$0xff]   ;;  %v1014_v7 = vld [vmem:[%s1315_s3 + $0x8] sm:$0xff]  }
   0x4   :  { %936 = vmatpush3.bf16.msra.mxu0 %v72_v3  ;;  %941 = vmatprep.subr.bf16.mxu1 %v1055_v2 }
   0x5   :  { %942 = vmatpush3.bf16.msra.mxu1 %v1013_v5  ;;  %949 = vmatprep.mubr.msk.bf16.mxu1 %vm1056_vm1, %v1055_v2 }
   0x6   :  { %943 = vmatprep.subr.bf16.mxu1 %v1055_v2  ;;  %953 = vmatprep.subr.bf16.mxu0 %v1055_v2 }
   0x8   :  { %v55_v1 = vld [vmem:[%s1331_s25] sm:$0xff]  ;;  %v56_v4 = vld [vmem:[%s1331_s25 + $0x8] sm:$0xff] }
   0x9   :  { %v57_v6 = vpack.c.bf16 %v56_v4, %v55_v1  ;;  %944 = vmatpush3.bf16.msra.mxu1 %v1014_v7 }
   0xa   :  { %945 = vmatprep.subr.bf16.mxu1 %v1055_v2 }
   0xb   :  { %938 = vmatmul.mubr.msk.bf16.vlgmr.msra.gmra.mrb[0].mxu0 %vm66_vm2, %v57_v6 }
   0xc   :  { %957 = vmatprep.mubr.msk.bf16.mxu0 %vm1056_vm1, %v1055_v2 }
   0xd   :  { %21 = vsyncpa [#allocation3], 0  ;;  %v1015_v8 = vld [vmem:[%s1315_s3 + $0x10] sm:$0xff]   ;;  %v1016_v9 = vld [vmem:[%s1315_s3 + $0x18] sm:$0xff]   ;;  %vm157_vm3 = vcmask 523264   ;;  %vm202_vm4 = vcmask 261120   ;;  %v298_v62 = vlaneseq }
   0xe   :  { %946 = vmatpush3.bf16.msra.mxu1 %v1015_v8  ;;  %v874_v10 = vld [vmem:[%s1314_s2] ss:$0 sm:$0xff]  ;;  %v1018_v21 = vld [vmem:[%s1318_s6 + $0x8] sm:$0xff]   ;;  %vm236_vm5 = vcmask 1041409   ;;  %v1057_v60 = vmov 1966171168  }
   0xf   :  { %947 = vmatprep.subr.bf16.mxu1 %v1055_v2  ;;  %v1017_v20 = vld [vmem:[%s1318_s6] sm:$0xff]   ;;  %v1020_v55 = vld [vmem:[%s1317_s5 + $0x8] sm:$0xff]   ;;  %v296_v61 = vunpack.c.l.s4 %v1057_v60  ;;  %v299_v0 = vshrl.u32 %v298_v62, 7  ;;  %s1058_s27 = smov [#allocation2]   ;;  %vm858_vm6 = vcmask 123904  }
  0x10   :  { %954 = vmatpush3.bf16.msra.mxu0 %v1017_v20  ;;  %v876_v22 = vld [vmem:[%s1316_s4] ss:$0 sm:$0xff]  ;;  %v1022_v57 = vld [vmem:[%s1320_s8 + $0x8] sm:$0xff]   ;;  %s866_s28 = sshll.u32 %s1058_s27, 4  ;;  %s867_s28 = int_to_ptr.vmem [resolvable:$true] %s866_s28 }
  0x11   :  { %955 = vmatprep.subr.bf16.mxu0 %v1055_v2  ;;  %v1019_v53 = vld [vmem:[%s1317_s5] sm:$0xff]   ;;  %v1024_v59 = vld [vmem:[%s1321_s9 + $0x8] sm:$0xff]   ;;  %v297_v63 = vunpack.c.0.s8 %v296_v61  ;;  %s1031_s1 = scalar_lea.vmem %s867_s28, 32  ;;  %p1036_p1 = scmp.lt.s32.totalorder %s867_s28, %s867_s28 }
  0x12   :  { %948 = vmatpush3.bf16.msra.mxu1 %v1016_v9  ;;  %v1021_v56 = vld [vmem:[%s1320_s8] sm:$0xff]   ;;  %p1032_p0 = scmp.ne.s32.totalorder %s867_s28, %s1031_s1  ;;  %p1037_p2 = scmp.lt.s32.totalorder %s1031_s1, %s1031_s1 }
  0x13   :  { %969 = vmatprep.subr.bf16.mxu1 %v1055_v2  ;;  %v1023_v58 = vld [vmem:[%s1321_s9] sm:$0xff]   ;;  %v1227_v1 = vsub.s32 %v297_v63, %v299_v0 }
  0x14   :  { %956 = vmatpush3.bf16.msra.mxu0 %v1018_v21  ;;  %p1038_p3 = por %p1037_p2, %p1036_p1 }
  0x15   :  { %961 = vmatprep.subr.bf16.mxu0 %v1055_v2 }
  0x16   :  { %p1039_p4 = pnand %p1038_p3, %p1032_p0 }
  0xde   :  { %v108_v11 = vpop.f32.mrb[0].mxu0 }
  0xdf   :  { %v109_v12 = vadd.f32 %v874_v10, %v108_v11  ;;  %v939_v13 = vpop.f32.mrb[1].mxu0 }
  0xe0   :  { %v111_v14 = vpop.f32.mrb[2].mxu0 }
  0xe1   :  { %v112_v15 = vadd.f32 %v874_v10, %v111_v14  ;;  %v940_v16 = vpop.f32.mrb[3].mxu0  ;;  %v115_v17 = vmax.f32 %v109_v12, 0.0  ;;  %v1231_v10 = vsub.s32 0, %v299_v0  ;;  %v888_v14 = vld [vmem:[%s1319_s7] ss:$0 sm:$0xff] }
  0xe3   :  { %v116_v18 = vmax.f32 %v112_v15, 0.0 }
  0xe5   :  { %v117_v19 = vpack.c.bf16 %v116_v18, %v115_v17 }
  0xe7   :  { %950 = vmatmul.mubr.msk.bf16.vlgmr.msra.gmra.mrb[0].mxu1 %vm157_vm3, %v117_v19 }
  0xe8   :  { %973 = vmatprep.mubr.msk.bf16.mxu1 %vm1056_vm1, %v1055_v2  ;;  %970 = vmatpush3.bf16.msra.mxu1 %v1023_v58 }
  0xe9   :  { %971 = vmatprep.subr.bf16.mxu1 %v1055_v2 }
  0xec   :  { %972 = vmatpush3.bf16.msra.mxu1 %v1024_v59 }
  0xed   :  { %985 = vmatprep.subr.bf16.mxu1 %v1055_v2 }
 0x1ba   :  { %v195_v23 = vpop.f32.mrb[0].mxu1 }
 0x1bb   :  { %v196_v24 = vadd.f32 %v876_v22, %v195_v23  ;;  %v951_v25 = vpop.f32.mrb[1].mxu1 }
 0x1bc   :  { %v198_v26 = vpop.f32.mrb[2].mxu1 }
 0x1bd   :  { %v203_v27 = vsel %vm202_vm4, %v196_v24, -inf  ;;  %v199_v28 = vadd.f32 %v876_v22, %v198_v26  ;;  %v952_v29 = vpop.f32.mrb[3].mxu1  ;;  %v217_v31 = vmax.f32 %v196_v24, 0.0 }
 0x1be   :  { %v204_v30 = vrot.slane %v203_v27, 4 }
 0x1bf   :  { %v210_v32 = vsel %vm202_vm4, %v199_v28, -inf  ;;  %v218_v33 = vmax.f32 %v199_v28, 0.0 }
 0x1c0   :  { %v205_v34 = vmax.f32 %v203_v27, %v204_v30  ;;  %v211_v35 = vrot.slane %v210_v32, 4 }
 0x1c1   :  { %v219_v36 = vpack.c.bf16 %v218_v33, %v217_v31 }
 0x1c2   :  { %v206_v37 = vrot.slane %v205_v34, 2  ;;  %v212_v38 = vmax.f32 %v210_v32, %v211_v35 }
 0x1c4   :  { %v207_v39 = vmax.f32 %v205_v34, %v206_v37  ;;  %v213_v40 = vrot.slane %v212_v38, 2 }
 0x1c6   :  { %v208_v41 = vrot.slane %v207_v39, 1  ;;  %v214_v42 = vmax.f32 %v212_v38, %v213_v40 }
 0x1c8   :  { %v209_v43 = vmax.f32 %v207_v39, %v208_v41  ;;  %v215_v44 = vrot.slane %v214_v42, 1 }
 0x1ca   :  { %v224_v45 = vmax.f32 %v209_v43, 0.0  ;;  %v216_v46 = vmax.f32 %v214_v42, %v215_v44 }
 0x1cc   :  { %v226_v47 = vpack.c.bf16 %v224_v45, %v224_v45  ;;  %v225_v48 = vmax.f32 %v216_v46, 0.0 }
 0x1ce   :  { %v227_v49 = vpack.c.bf16 %v225_v48, %v225_v48  ;;  %v234_v50 = vunpack.c.l.b16 %v226_v47  ;;  %v1025_v48 = vld [vmem:[%s1323_s11] sm:$0xff]  }
 0x1d0   :  { %v235_v51 = vunpack.c.l.b16 %v227_v49  ;;  %v1026_v49 = vld [vmem:[%s1323_s11 + $0x8] sm:$0xff]  }
 0x1d2   :  { %v237_v52 = vsel %vm236_vm5, %v235_v51, %v234_v50  ;;  %v1027_v50 = vld [vmem:[%s1324_s12] sm:$0xff]   ;;  %v1028_v51 = vld [vmem:[%s1324_s12 + $0x8] sm:$0xff]  }
 0x1d3   :  { %v238_v54 = vpack.c.b16 %v237_v52, %v237_v52 }
 0x1d5   :  { %958 = vmatmul.mubr.msk.bf16.vlgmr.msra.gmra.mrb[4].mxu0 %vm202_vm4, %v238_v54 }
 0x1d6   :  { %962 = vmatpush3.bf16.msra.mxu0 %v1019_v53  ;;  %965 = vmatprep.mubr.msk.bf16.mxu0 %vm1056_vm1, %v1055_v2 }
 0x1d7   :  { %963 = vmatprep.subr.bf16.mxu0 %v1055_v2 }
 0x1da   :  { %964 = vmatpush3.bf16.msra.mxu0 %v1020_v55 }
 0x1db   :  { %977 = vmatprep.subr.bf16.mxu0 %v1055_v2 }
 0x1dd   :  { %966 = vmatmul.mubr.msk.bf16.vlgmr.msra.gmra.mrb[8].mxu0 %vm202_vm4, %v219_v36 }
 0x1de   :  { %981 = vmatprep.mubr.msk.bf16.mxu0 %vm1056_vm1, %v1055_v2  ;;  %978 = vmatpush3.bf16.msra.mxu0 %v1021_v56 }
 0x1df   :  { %979 = vmatprep.subr.bf16.mxu0 %v1055_v2 }
 0x1e2   :  { %980 = vmatpush3.bf16.msra.mxu0 %v1022_v57 }
 0x1e3   :  { %993 = vmatprep.subr.bf16.mxu0 %v1055_v2 }
 0x2a8   :  { %v288_v3 = vpop.f32.mrb[4].mxu0 }
 0x2a9   :  { %v301_v4 = vrot.slane %v288_v3, %v1227_v1  ;;  %v959_v5 = vpop.f32.mrb[5].mxu0  ;;  %v895_v3 = vld [vmem:[%s1322_s10] ss:$0 sm:$0xff] }
 0x2aa   :  { %v291_v6 = vpop.f32.mrb[6].mxu0 }
 0x2ab   :  { %v302_v7 = vcombine.high %v301_v4, %v301_v4  ;;  %v309_v8 = vrot.slane %v301_v4, %v1227_v1  ;;  %v960_v9 = vpop.f32.mrb[7].mxu0 }
 0x2ad   :  { %v316_v11 = vrot.slane %v302_v7, %v1227_v1  ;;  %v320_v12 = vrot.slane %v309_v8, %v1231_v10 }
 0x2af   :  { %v324_v17 = vrot.slane %v316_v11, %v1231_v10 }
 0x2b0   :  { %v376_v13 = vpop.f32.mrb[8].mxu0 }
 0x2b1   :  { %v377_v15 = vadd.f32 %v376_v13, %v320_v12  ;;  %v967_v16 = vpop.f32.mrb[9].mxu0 }
 0x2b2   :  { %v379_v18 = vpop.f32.mrb[10].mxu0 }
 0x2b3   :  { %v390_v19 = vadd.f32 %v888_v14, %v377_v15  ;;  %v380_v20 = vadd.f32 %v379_v18, %v324_v17  ;;  %v968_v21 = vpop.f32.mrb[11].mxu0 }
 0x2b5   :  { %v392_v22 = vsel %vm202_vm4, %v390_v19, -inf  ;;  %v391_v23 = vadd.f32 %v888_v14, %v380_v20  ;;  %v406_v25 = vmax.f32 %v390_v19, 0.0 }
 0x2b6   :  { %v393_v24 = vrot.slane %v392_v22, 4 }
 0x2b7   :  { %v399_v26 = vsel %vm202_vm4, %v391_v23, -inf  ;;  %v407_v27 = vmax.f32 %v391_v23, 0.0 }
 0x2b8   :  { %v394_v28 = vmax.f32 %v392_v22, %v393_v24  ;;  %v400_v29 = vrot.slane %v399_v26, 4 }
 0x2b9   :  { %v408_v30 = vpack.c.bf16 %v407_v27, %v406_v25 }
 0x2ba   :  { %v395_v31 = vrot.slane %v394_v28, 2  ;;  %v401_v32 = vmax.f32 %v399_v26, %v400_v29 }
 0x2bb   :  { %982 = vmatmul.mubr.msk.bf16.vlgmr.msra.gmra.mrb[12].mxu0 %vm202_vm4, %v408_v30 }
 0x2bc   :  { %v396_v33 = vmax.f32 %v394_v28, %v395_v31  ;;  %v402_v34 = vrot.slane %v401_v32, 2  ;;  %997 = vmatprep.mubr.msk.bf16.mxu0 %vm1056_vm1, %v1055_v2  ;;  %994 = vmatpush3.bf16.msra.mxu0 %v1025_v48 }
 0x2bd   :  { %995 = vmatprep.subr.bf16.mxu0 %v1055_v2 }
 0x2be   :  { %v397_v35 = vrot.slane %v396_v33, 1  ;;  %v403_v36 = vmax.f32 %v401_v32, %v402_v34 }
 0x2c0   :  { %v398_v37 = vmax.f32 %v396_v33, %v397_v35  ;;  %v404_v38 = vrot.slane %v403_v36, 1  ;;  %996 = vmatpush3.bf16.msra.mxu0 %v1026_v49  ;;  %v1029_v35 = vld [vmem:[%s1326_s14] sm:$0xff]  }
 0x2c2   :  { %v413_v39 = vmax.f32 %v398_v37, 0.0  ;;  %v405_v40 = vmax.f32 %v403_v36, %v404_v38  ;;  %v1030_v36 = vld [vmem:[%s1326_s14 + $0x8] sm:$0xff]  }
 0x2c4   :  { %v415_v41 = vpack.c.bf16 %v413_v39, %v413_v39  ;;  %v414_v42 = vmax.f32 %v405_v40, 0.0 }
 0x2c6   :  { %v416_v43 = vpack.c.bf16 %v414_v42, %v414_v42  ;;  %v423_v44 = vunpack.c.l.b16 %v415_v41 }
 0x2c8   :  { %v424_v45 = vunpack.c.l.b16 %v416_v43 }
 0x2ca   :  { %v425_v46 = vsel %vm236_vm5, %v424_v45, %v423_v44 }
 0x2cb   :  { %v426_v47 = vpack.c.b16 %v425_v46, %v425_v46 }
 0x2cd   :  { %974 = vmatmul.mubr.msk.bf16.vlgmr.msra.gmra.mrb[4].mxu1 %vm202_vm4, %v426_v47 }
 0x2ce   :  { %989 = vmatprep.mubr.msk.bf16.mxu1 %vm1056_vm1, %v1055_v2  ;;  %986 = vmatpush3.bf16.msra.mxu1 %v1027_v50 }
 0x2cf   :  { %987 = vmatprep.subr.bf16.mxu1 %v1055_v2 }
 0x2d2   :  { %988 = vmatpush3.bf16.msra.mxu1 %v1028_v51 }
 0x2d3   :  { %1001 = vmatprep.subr.bf16.mxu1 %v1055_v2 }
 0x38e   :  { %v564_v52 = vpop.f32.mrb[12].mxu0 }
 0x38f   :  { %v983_v53 = vpop.f32.mrb[13].mxu0 }
 0x390   :  { %v567_v54 = vpop.f32.mrb[14].mxu0 }
 0x391   :  { %v984_v55 = vpop.f32.mrb[15].mxu0 }
 0x3a0   :  { %v476_v56 = vpop.f32.mrb[4].mxu1 }
 0x3a1   :  { %v489_v57 = vrot.slane %v476_v56, %v1227_v1  ;;  %v975_v58 = vpop.f32.mrb[5].mxu1 }
 0x3a2   :  { %v479_v59 = vpop.f32.mrb[6].mxu1 }
 0x3a3   :  { %v490_v60 = vcombine.high %v489_v57, %v489_v57  ;;  %v497_v61 = vrot.slane %v489_v57, %v1227_v1  ;;  %v976_v62 = vpop.f32.mrb[7].mxu1 }
 0x3a5   :  { %v504_v63 = vrot.slane %v490_v60, %v1227_v1  ;;  %v508_v0 = vrot.slane %v497_v61, %v1231_v10 }
 0x3a7   :  { %v512_v4 = vrot.slane %v504_v63, %v1231_v10  ;;  %v565_v5 = vadd.f32 %v564_v52, %v508_v0 }
 0x3a9   :  { %v568_v6 = vadd.f32 %v567_v54, %v512_v4  ;;  %v578_v7 = vadd.f32 %v895_v3, %v565_v5 }
 0x3ab   :  { %v579_v8 = vadd.f32 %v895_v3, %v568_v6  ;;  %v580_v9 = vsel %vm202_vm4, %v578_v7, -inf  ;;  %v594_v13 = vmax.f32 %v578_v7, 0.0 }
 0x3ac   :  { %v581_v11 = vrot.slane %v580_v9, 4 }
 0x3ad   :  { %v587_v12 = vsel %vm202_vm4, %v579_v8, -inf  ;;  %v595_v14 = vmax.f32 %v579_v8, 0.0 }
 0x3ae   :  { %v582_v15 = vmax.f32 %v580_v9, %v581_v11  ;;  %v588_v16 = vrot.slane %v587_v12, 4 }
 0x3af   :  { %v596_v17 = vpack.c.bf16 %v595_v14, %v594_v13  ;;  %v903_v14 = vld [vmem:[%s1327_s15] ss:$0 sm:$0xff] }
 0x3b0   :  { %v583_v18 = vrot.slane %v582_v15, 2  ;;  %v589_v19 = vmax.f32 %v587_v12, %v588_v16 }
 0x3b1   :  { %998 = vmatmul.mubr.msk.bf16.vlgmr.msra.gmra.mrb[16].mxu0 %vm202_vm4, %v596_v17 }
 0x3b2   :  { %v584_v20 = vmax.f32 %v582_v15, %v583_v18  ;;  %v590_v21 = vrot.slane %v589_v19, 2 }
 0x3b4   :  { %v585_v22 = vrot.slane %v584_v20, 1  ;;  %v591_v23 = vmax.f32 %v589_v19, %v590_v21 }
 0x3b6   :  { %v586_v24 = vmax.f32 %v584_v20, %v585_v22  ;;  %v592_v25 = vrot.slane %v591_v23, 1 }
 0x3b8   :  { %v593_v26 = vmax.f32 %v591_v23, %v592_v25  ;;  %v601_v27 = vmax.f32 %v586_v24, 0.0 }
 0x3ba   :  { %v603_v28 = vpack.c.bf16 %v601_v27, %v601_v27  ;;  %v602_v29 = vmax.f32 %v593_v26, 0.0 }
 0x3bc   :  { %v604_v30 = vpack.c.bf16 %v602_v29, %v602_v29  ;;  %v611_v31 = vunpack.c.l.b16 %v603_v28 }
 0x3be   :  { %v612_v32 = vunpack.c.l.b16 %v604_v30 }
 0x3c0   :  { %v613_v33 = vsel %vm236_vm5, %v612_v32, %v611_v31 }
 0x3c1   :  { %v614_v34 = vpack.c.b16 %v613_v33, %v613_v33 }
 0x3c3   :  { %990 = vmatmul.mubr.msk.bf16.vlgmr.msra.gmra.mrb[8].mxu1 %vm202_vm4, %v614_v34 }
 0x3c4   :  { %1005 = vmatprep.mubr.msk.bf16.mxu1 %vm1056_vm1, %v1055_v2  ;;  %1002 = vmatpush3.bf16.msra.mxu1 %v1029_v35 }
 0x3c5   :  { %1003 = vmatprep.subr.bf16.mxu1 %v1055_v2  ;;  %v902_v2 = vld [vmem:[%s1325_s13] ss:$0 sm:$0xff] }
 0x3c8   :  { %1004 = vmatpush3.bf16.msra.mxu1 %v1030_v36 }
 0x484   :  { %v752_v37 = vpop.f32.mrb[16].mxu0 }
 0x485   :  { %v999_v38 = vpop.f32.mrb[17].mxu0 }
 0x486   :  { %v755_v39 = vpop.f32.mrb[18].mxu0 }
 0x487   :  { %v1000_v40 = vpop.f32.mrb[19].mxu0 }
 0x496   :  { %v664_v41 = vpop.f32.mrb[8].mxu1 }
 0x497   :  { %v677_v42 = vrot.slane %v664_v41, %v1227_v1  ;;  %v991_v43 = vpop.f32.mrb[9].mxu1 }
 0x498   :  { %v667_v44 = vpop.f32.mrb[10].mxu1 }
 0x499   :  { %v678_v45 = vcombine.high %v677_v42, %v677_v42  ;;  %v685_v46 = vrot.slane %v677_v42, %v1227_v1  ;;  %v992_v47 = vpop.f32.mrb[11].mxu1 }
 0x49b   :  { %v692_v48 = vrot.slane %v678_v45, %v1227_v1  ;;  %v696_v49 = vrot.slane %v685_v46, %v1231_v10 }
 0x49d   :  { %v700_v50 = vrot.slane %v692_v48, %v1231_v10  ;;  %v753_v51 = vadd.f32 %v752_v37, %v696_v49 }
 0x49f   :  { %v756_v52 = vadd.f32 %v755_v39, %v700_v50  ;;  %v766_v53 = vadd.f32 %v902_v2, %v753_v51 }
 0x4a1   :  { %v767_v54 = vadd.f32 %v902_v2, %v756_v52  ;;  %v768_v55 = vsel %vm202_vm4, %v766_v53, -inf }
 0x4a2   :  { %v769_v56 = vrot.slane %v768_v55, 4 }
 0x4a3   :  { %v775_v57 = vsel %vm202_vm4, %v767_v54, -inf }
 0x4a4   :  { %v770_v58 = vmax.f32 %v768_v55, %v769_v56  ;;  %v776_v59 = vrot.slane %v775_v57, 4 }
 0x4a6   :  { %v771_v1 = vrot.slane %v770_v58, 2  ;;  %v777_v60 = vmax.f32 %v775_v57, %v776_v59 }
 0x4a8   :  { %v772_v61 = vmax.f32 %v770_v58, %v771_v1  ;;  %v778_v62 = vrot.slane %v777_v60, 2 }
 0x4aa   :  { %v773_v63 = vrot.slane %v772_v61, 1  ;;  %v779_v0 = vmax.f32 %v777_v60, %v778_v62 }
 0x4ac   :  { %v774_v3 = vmax.f32 %v772_v61, %v773_v63  ;;  %v780_v4 = vrot.slane %v779_v0, 1 }
 0x4ae   :  { %v781_v10 = vmax.f32 %v779_v0, %v780_v4  ;;  %v782_v5 = vmax.f32 %v774_v3, 0.0 }
 0x4b0   :  { %v784_v6 = vpack.c.bf16 %v782_v5, %v782_v5  ;;  %v783_v7 = vmax.f32 %v781_v10, 0.0 }
 0x4b2   :  { %v785_v8 = vpack.c.bf16 %v783_v7, %v783_v7  ;;  %v799_v9 = vunpack.c.l.b16 %v784_v6 }
 0x4b4   :  { %v800_v11 = vunpack.c.l.b16 %v785_v8 }
 0x4b6   :  { %v801_v12 = vsel %vm236_vm5, %v800_v11, %v799_v9 }
 0x4b7   :  { %v802_v13 = vpack.c.b16 %v801_v12, %v801_v12 }
 0x4b9   :  { %1006 = vmatmul.mubr.msk.bf16.vlgmr.msra.gmra.mrb[12].mxu1 %vm202_vm4, %v802_v13 }
 0x58c   :  { %v852_v15 = vpop.f32.mrb[12].mxu1 }
 0x58d   :  { %v853_v16 = vadd.f32 %v903_v14, %v852_v15  ;;  %v1007_v17 = vpop.f32.mrb[13].mxu1 }
 0x58e   :  { %v855_v18 = vpop.f32.mrb[14].mxu1 }
 0x58f   :  { %v1008_v19 = vpop.f32.mrb[15].mxu1  ;;  %859 = vst.msk [vmem:[#allocation2] sm:$0x3] %vm858_vm6, %v853_v16 }
 0x590   :  { %1042 = shalt.err (!%p1039_p4)
}
 0x591   :  { %s1043_s15 = scalar_lea.hbm %s1328_s16, 32 }
 0x592   :  { %p1044_p5 = scmp.ne.s32.totalorder %s1328_s16, %s1043_s15  ;;  %p1047_p6 = scmp.lt.u32.totalorder %s1043_s15, %s1328_s16 }
 0x594   :  { %p1049_p7 = pnand %p1047_p6, %p1044_p5 }
 0x596   :  { %1052 = shalt.err (!%p1049_p7)
}
 0x597   :  { %869 = dma.vmem_to_hbm [thread:$0]  %s867_s28, 32, %s1328_s16, [#allocation3]  }
 0x598   :  { %1053 = dma.done.wait [#allocation3], 32  }
 0x599   :  { %1054 = vsyncadd [#allocation3], 4294967264 }
 0x59a   :  { %873 = vsyncpa [#allocation3], 1 }

</bundles_post_ra>
